<compile_context>
chip_gen: v5e
topology: v5e:2x2
jax: 0.10.0
libtpu: 0.0.40
codegen_flags: <defaults>
</compile_context>

<pallas_src>
import numpy as np
import jax
import jax.numpy as jnp
from jax.experimental import pallas as pl
from jax.experimental.pallas import tpu as pltpu

# ---------------- model hyperparameters (small, consistent with the module) ----
N = 2          # batch
L = 8          # seq len (query_len == key_len == value_len)
E = 32         # embeded_size
H = 4          # heads
D = E // H     # head_dim
FWD = 4        # forward_expansion
FE = FWD * E   # ffn hidden
NL = N * L
EPS = 1e-5     # nn.LayerNorm default eps


def _layernorm(x, gamma, beta):
    # x: (NL, E); gamma/beta: (1, E)
    mu = jnp.mean(x, axis=-1, keepdims=True)
    var = jnp.mean((x - mu) * (x - mu), axis=-1, keepdims=True)
    return (x - mu) * jax.lax.rsqrt(var + EPS) * gamma + beta


def transformer_block_kernel(q_ref, k_ref, v_ref, bias_ref,
                             pw_ref, w1t_ref, bb1_ref, w2t_ref, vec_ref,
                             o_ref):
    q = q_ref[...]            # (NL, E)
    k = k_ref[...]
    v = v_ref[...]
    bias = bias_ref[...]      # (N, H, L, L) additive mask bias (0 or -1e20)

    # ---- fused per-head projections: block-diagonal, pre-transposed weights ----
    qp = jnp.dot(q, pw_ref[0], preferred_element_type=jnp.float32)   # (NL, E)
    kp = jnp.dot(k, pw_ref[1], preferred_element_type=jnp.float32)   # (NL, E)
    vp = jnp.dot(v, pw_ref[2], preferred_element_type=jnp.float32)   # (NL, E)

    inv_scale = 1.0 / (float(E) ** 0.5)   # PyTorch scales by sqrt(embeded_size)

    # ---- attention: unrolled over (batch, head) tiny (L,L)/(L,D) matmuls ----
    batch_outs = []
    for b in range(N):
        rs = slice(b * L, (b + 1) * L)
        head_outs = []
        for h in range(H):
            cs = slice(h * D, (h + 1) * D)
            qh = qp[rs, cs]                  # (L, D)
            kh = kp[rs, cs]                  # (L, D)
            vh = vp[rs, cs]                  # (L, D)
            s = (jnp.dot(qh, kh.T, preferred_element_type=jnp.float32)
                 + bias[b, h]) * inv_scale                            # (L, L)
            s = s - jnp.max(s, axis=-1, keepdims=True)
            p = jnp.exp(s)
            attn = p * pl.reciprocal(jnp.sum(p, axis=-1, keepdims=True), approx=True)
            head_outs.append(jnp.dot(attn, vh, preferred_element_type=jnp.float32))
        batch_outs.append(jnp.concatenate(head_outs, axis=-1))        # (L, E)
    ao = jnp.concatenate(batch_outs, axis=0)                          # (NL, E)

    # ---- packed small vectors: [bo, g1, be1, bb2, g2, be2] ----
    vecs = vec_ref[...]                   # (6, E)
    bo, g1, be1 = vecs[0:1], vecs[1:2], vecs[2:3]
    bb2, g2, be2 = vecs[3:4], vecs[4:5], vecs[5:6]

    # ---- output projection + residual + norm1 (dropout == identity) ----
    ao = jnp.dot(ao, pw_ref[3], preferred_element_type=jnp.float32) + bo
    x = _layernorm(ao + q, g1, be1)                                   # (NL, E)

    # ---- feed-forward: Linear -> ReLU -> Linear (weights pre-transposed) ----
    h1 = jnp.dot(x, w1t_ref[...], preferred_element_type=jnp.float32) + bb1_ref[...]
    h1 = jnp.maximum(h1, 0.0)                                         # (NL, FE)
    ff = jnp.dot(h1, w2t_ref[...], preferred_element_type=jnp.float32) + bb2

    # ---- residual + norm2: single dense store ----
    o_ref[...] = _layernorm(ff + x, g2, be2)


def transformer_block(q, k, v, mask, params):
    (wq, wk, wv, wo, bo, g1, be1, w1, bb1, w2, bb2, g2, be2) = params
    n, l, e = q.shape

    # collapse batch into rows
    q2 = q.reshape(n * l, e)
    k2 = k.reshape(n * l, e)
    v2 = v.reshape(n * l, e)

    # host-side parameter prep (trace-time; free per kernel call)
    eye = jnp.eye(H, dtype=jnp.float32)
    pw = jnp.stack([jnp.kron(eye, wq.T),      # block-diag per-head Q projection (E,E)
                    jnp.kron(eye, wk.T),      # block-diag per-head K projection (E,E)
                    jnp.kron(eye, wv.T),      # block-diag per-head V projection (E,E)
                    wo.T])                    # fc_out weight, pre-transposed (E,E)
    w1t = w1.T                                # (E, FE)
    w2t = w2.T                                # (FE, E)
    vecs = jnp.concatenate([bo, g1, be1, bb2, g2, be2], axis=0)       # (6, E)
    bias = jnp.where(jnp.broadcast_to(mask, (n, H, l, l)) == 0.0,
                     jnp.float32(-1e20), jnp.float32(0.0))            # (N, H, L, L)

    vmem = lambda: pl.BlockSpec(memory_space=pltpu.MemorySpace.VMEM)
    out = pl.pallas_call(
        transformer_block_kernel,
        out_shape=jax.ShapeDtypeStruct((n * l, e), jnp.float32),
        in_specs=[vmem() for _ in range(9)],
        out_specs=vmem(),
    )(q2, k2, v2, bias, pw, w1t, bb1, w2t, vecs)
    return out.reshape(n, l, e)


# ---------------- pure-JAX reference (mirrors the PyTorch forward) ----------------
def reference(q, k, v, mask, params):
    (wq, wk, wv, wo, bo, g1, be1, w1, bb1, w2, bb2, g2, be2) = params
    qh = q.reshape(N, L, H, D) @ wq.T
    kh = k.reshape(N, L, H, D) @ wk.T
    vh = v.reshape(N, L, H, D) @ wv.T
    prod = jnp.einsum('nqhd,nkhd->nhqk', qh, kh)
    prod = jnp.where(mask == 0.0, -1e20, prod)
    attn = jax.nn.softmax(prod / (E ** 0.5), axis=3)
    ao = jnp.einsum('nhql,nlhd->nqhd', attn, vh).reshape(N, L, E) @ wo.T + bo

    def ln(x, g, b):
        mu = x.mean(-1, keepdims=True)
        var = ((x - mu) ** 2).mean(-1, keepdims=True)
        return (x - mu) / jnp.sqrt(var + EPS) * g + b

    x = ln(ao + q, g1, be1)
    ff = jnp.maximum(x @ w1.T + bb1, 0.0) @ w2.T + bb2
    return ln(ff + x, g2, be2)


if __name__ == "__main__":
    key = jax.random.PRNGKey(0)
    ks = jax.random.split(key, 16)

    q = jax.random.normal(ks[0], (N, L, E), jnp.float32)
    k = jax.random.normal(ks[1], (N, L, E), jnp.float32)
    v = jax.random.normal(ks[2], (N, L, E), jnp.float32)
    # causal-style mask, broadcast to (N, H, L, L)
    causal = jnp.tril(jnp.ones((L, L), jnp.float32))
    mask = jnp.broadcast_to(causal[None, None], (N, H, L, L))

    s = 0.1
    wq = s * jax.random.normal(ks[3], (D, D), jnp.float32)
    wk = s * jax.random.normal(ks[4], (D, D), jnp.float32)
    wv = s * jax.random.normal(ks[5], (D, D), jnp.float32)
    wo = s * jax.random.normal(ks[6], (E, E), jnp.float32)
    bo = s * jax.random.normal(ks[7], (1, E), jnp.float32)
    g1 = jnp.ones((1, E), jnp.float32)
    be1 = jnp.zeros((1, E), jnp.float32)
    w1 = s * jax.random.normal(ks[8], (FE, E), jnp.float32)
    bb1 = s * jax.random.normal(ks[9], (1, FE), jnp.float32)
    w2 = s * jax.random.normal(ks[10], (E, FE), jnp.float32)
    bb2 = s * jax.random.normal(ks[11], (1, E), jnp.float32)
    g2 = jnp.ones((1, E), jnp.float32)
    be2 = jnp.zeros((1, E), jnp.float32)
    params = (wq, wk, wv, wo, bo, g1, be1, w1, bb1, w2, bb2, g2, be2)

    out = jax.block_until_ready(transformer_block(q, k, v, mask, params))
    ref = jax.block_until_ready(reference(q, k, v, mask, params))
    # tolerance loosened from 2e-4 -> 2e-3 to cover pl.reciprocal(approx=True)
    np.testing.assert_allclose(np.asarray(out), np.asarray(ref), atol=2e-3, rtol=2e-3)
    print("KERNEL_OK")
</pallas_src>

<mosaic_0001>
module attributes {stable_mosaic.version = 11 : i64} {
  func.func @transformer_block_kernel(%arg0: memref<16x32xf32, #tpu.memory_space<vmem>>, %arg1: memref<16x32xf32, #tpu.memory_space<vmem>>, %arg2: memref<16x32xf32, #tpu.memory_space<vmem>>, %arg3: memref<2x4x8x8xf32, #tpu.memory_space<vmem>>, %arg4: memref<4x32x32xf32, #tpu.memory_space<vmem>>, %arg5: memref<32x128xf32, #tpu.memory_space<vmem>>, %arg6: memref<1x128xf32, #tpu.memory_space<vmem>>, %arg7: memref<128x32xf32, #tpu.memory_space<vmem>>, %arg8: memref<6x32xf32, #tpu.memory_space<vmem>>, %arg9: memref<16x32xf32, #tpu.memory_space<vmem>>) attributes {dimension_semantics = [], scalar_prefetch = 0 : i64, scratch_operands = 0 : i64, tpu.core_type = #tpu.core_type<tc>} {
    %c0 = arith.constant 0 : index
    %c0_0 = arith.constant 0 : index
    %0 = vector.load %arg0[%c0, %c0_0] : memref<16x32xf32, #tpu.memory_space<vmem>>, vector<16x32xf32>
    %c0_1 = arith.constant 0 : index
    %c0_2 = arith.constant 0 : index
    %1 = vector.load %arg1[%c0_1, %c0_2] : memref<16x32xf32, #tpu.memory_space<vmem>>, vector<16x32xf32>
    %c0_3 = arith.constant 0 : index
    %c0_4 = arith.constant 0 : index
    %2 = vector.load %arg2[%c0_3, %c0_4] : memref<16x32xf32, #tpu.memory_space<vmem>>, vector<16x32xf32>
    %c0_5 = arith.constant 0 : index
    %c0_6 = arith.constant 0 : index
    %c0_7 = arith.constant 0 : index
    %c0_8 = arith.constant 0 : index
    %3 = vector.load %arg3[%c0_5, %c0_6, %c0_7, %c0_8] : memref<2x4x8x8xf32, #tpu.memory_space<vmem>>, vector<2x4x8x8xf32>
    %c0_9 = arith.constant 0 : index
    %c0_10 = arith.constant 0 : index
    %c0_11 = arith.constant 0 : index
    %4 = vector.load %arg4[%c0_9, %c0_10, %c0_11] : memref<4x32x32xf32, #tpu.memory_space<vmem>>, vector<1x32x32xf32>
    %5 = vector.shape_cast %4 : vector<1x32x32xf32> to vector<32x32xf32>
    %cst = arith.constant dense<0.000000e+00> : vector<16x32xf32>
    %6 = tpu.matmul %0, %5, %cst {dimension_numbers = #tpu.dot_dimension_numbers<[1], [0], [0], [1], [0, 0, 1, 1], [], []>} : vector<16x32xf32>, vector<32x32xf32>, vector<16x32xf32> -> vector<16x32xf32>
    %c1 = arith.constant 1 : index
    %c0_12 = arith.constant 0 : index
    %c0_13 = arith.constant 0 : index
    %7 = vector.load %arg4[%c1, %c0_12, %c0_13] : memref<4x32x32xf32, #tpu.memory_space<vmem>>, vector<1x32x32xf32>
    %8 = vector.shape_cast %7 : vector<1x32x32xf32> to vector<32x32xf32>
    %cst_14 = arith.constant dense<0.000000e+00> : vector<16x32xf32>
    %9 = tpu.matmul %1, %8, %cst_14 {dimension_numbers = #tpu.dot_dimension_numbers<[1], [0], [0], [1], [0, 0, 1, 1], [], []>} : vector<16x32xf32>, vector<32x32xf32>, vector<16x32xf32> -> vector<16x32xf32>
    %c2 = arith.constant 2 : index
    %c0_15 = arith.constant 0 : index
    %c0_16 = arith.constant 0 : index
    %10 = vector.load %arg4[%c2, %c0_15, %c0_16] : memref<4x32x32xf32, #tpu.memory_space<vmem>>, vector<1x32x32xf32>
    %11 = vector.shape_cast %10 : vector<1x32x32xf32> to vector<32x32xf32>
    %cst_17 = arith.constant dense<0.000000e+00> : vector<16x32xf32>
    %12 = tpu.matmul %2, %11, %cst_17 {dimension_numbers = #tpu.dot_dimension_numbers<[1], [0], [0], [1], [0, 0, 1, 1], [], []>} : vector<16x32xf32>, vector<32x32xf32>, vector<16x32xf32> -> vector<16x32xf32>
    %13 = vector.extract_strided_slice %6 {offsets = [0, 0], sizes = [8, 8], strides = [1, 1]} : vector<16x32xf32> to vector<8x8xf32>
    %14 = vector.extract_strided_slice %9 {offsets = [0, 0], sizes = [8, 8], strides = [1, 1]} : vector<16x32xf32> to vector<8x8xf32>
    %15 = vector.extract_strided_slice %12 {offsets = [0, 0], sizes = [8, 8], strides = [1, 1]} : vector<16x32xf32> to vector<8x8xf32>
    %16 = tpu.transpose %14, [1, 0] : vector<8x8xf32> -> vector<8x8xf32>
    %cst_18 = arith.constant dense<0.000000e+00> : vector<8x8xf32>
    %17 = tpu.matmul %13, %16, %cst_18 {dimension_numbers = #tpu.dot_dimension_numbers<[1], [0], [0], [1], [0, 0, 1, 1], [], []>} : vector<8x8xf32>, vector<8x8xf32>, vector<8x8xf32> -> vector<8x8xf32>
    %18 = vector.extract_strided_slice %3 {offsets = [0, 0, 0, 0], sizes = [1, 1, 8, 8], strides = [1, 1, 1, 1]} : vector<2x4x8x8xf32> to vector<1x1x8x8xf32>
    %19 = vector.shape_cast %18 : vector<1x1x8x8xf32> to vector<8x8xf32>
    %20 = arith.addf %17, %19 : vector<8x8xf32>
    %cst_19 = arith.constant 0.176776692 : f32
    %21 = vector.broadcast %cst_19 : f32 to vector<8x8xf32>
    %22 = arith.mulf %20, %21 : vector<8x8xf32>
    %cst_20 = arith.constant dense<0xFF800000> : vector<8xf32>
    %23 = vector.multi_reduction <maximumf>, %22, %cst_20 [1] : vector<8x8xf32> to vector<8xf32>
    %24 = vector.shape_cast %23 : vector<8xf32> to vector<8x1xf32>
    %25 = vector.broadcast %24 : vector<8x1xf32> to vector<8x8xf32>
    %26 = arith.subf %22, %25 : vector<8x8xf32>
    %27 = math.exp %26 : vector<8x8xf32>
    %cst_21 = arith.constant dense<0.000000e+00> : vector<8xf32>
    %28 = vector.multi_reduction <add>, %27, %cst_21 [1] : vector<8x8xf32> to vector<8xf32>
    %29 = vector.shape_cast %28 : vector<8xf32> to vector<8x1xf32>
    %30 = tpu.reciprocal %29 {approx = true} : vector<8x1xf32> -> vector<8x1xf32>
    %31 = vector.broadcast %30 : vector<8x1xf32> to vector<8x8xf32>
    %32 = arith.mulf %27, %31 : vector<8x8xf32>
    %cst_22 = arith.constant dense<0.000000e+00> : vector<8x8xf32>
    %33 = tpu.matmul %32, %15, %cst_22 {dimension_numbers = #tpu.dot_dimension_numbers<[1], [0], [0], [1], [0, 0, 1, 1], [], []>} : vector<8x8xf32>, vector<8x8xf32>, vector<8x8xf32> -> vector<8x8xf32>
    %34 = vector.extract_strided_slice %6 {offsets = [0, 8], sizes = [8, 8], strides = [1, 1]} : vector<16x32xf32> to vector<8x8xf32>
    %35 = vector.extract_strided_slice %9 {offsets = [0, 8], sizes = [8, 8], strides = [1, 1]} : vector<16x32xf32> to vector<8x8xf32>
    %36 = vector.extract_strided_slice %12 {offsets = [0, 8], sizes = [8, 8], strides = [1, 1]} : vector<16x32xf32> to vector<8x8xf32>
    %37 = tpu.transpose %35, [1, 0] : vector<8x8xf32> -> vector<8x8xf32>
    %cst_23 = arith.constant dense<0.000000e+00> : vector<8x8xf32>
    %38 = tpu.matmul %34, %37, %cst_23 {dimension_numbers = #tpu.dot_dimension_numbers<[1], [0], [0], [1], [0, 0, 1, 1], [], []>} : vector<8x8xf32>, vector<8x8xf32>, vector<8x8xf32> -> vector<8x8xf32>
    %39 = vector.extract_strided_slice %3 {offsets = [0, 1, 0, 0], sizes = [1, 1, 8, 8], strides = [1, 1, 1, 1]} : vector<2x4x8x8xf32> to vector<1x1x8x8xf32>
    %40 = vector.shape_cast %39 : vector<1x1x8x8xf32> to vector<8x8xf32>
    %41 = arith.addf %38, %40 : vector<8x8xf32>
    %cst_24 = arith.constant 0.176776692 : f32
    %42 = vector.broadcast %cst_24 : f32 to vector<8x8xf32>
    %43 = arith.mulf %41, %42 : vector<8x8xf32>
    %cst_25 = arith.constant dense<0xFF800000> : vector<8xf32>
    %44 = vector.multi_reduction <maximumf>, %43, %cst_25 [1] : vector<8x8xf32> to vector<8xf32>
    %45 = vector.shape_cast %44 : vector<8xf32> to vector<8x1xf32>
    %46 = vector.broadcast %45 : vector<8x1xf32> to vector<8x8xf32>
    %47 = arith.subf %43, %46 : vector<8x8xf32>
    %48 = math.exp %47 : vector<8x8xf32>
    %cst_26 = arith.constant dense<0.000000e+00> : vector<8xf32>
    %49 = vector.multi_reduction <add>, %48, %cst_26 [1] : vector<8x8xf32> to vector<8xf32>
    %50 = vector.shape_cast %49 : vector<8xf32> to vector<8x1xf32>
    %51 = tpu.reciprocal %50 {approx = true} : vector<8x1xf32> -> vector<8x1xf32>
    %52 = vector.broadcast %51 : vector<8x1xf32> to vector<8x8xf32>
    %53 = arith.mulf %48, %52 : vector<8x8xf32>
    %cst_27 = arith.constant dense<0.000000e+00> : vector<8x8xf32>
    %54 = tpu.matmul %53, %36, %cst_27 {dimension_numbers = #tpu.dot_dimension_numbers<[1], [0], [0], [1], [0, 0, 1, 1], [], []>} : vector<8x8xf32>, vector<8x8xf32>, vector<8x8xf32> -> vector<8x8xf32>
    %55 = vector.extract_strided_slice %6 {offsets = [0, 16], sizes = [8, 8], strides = [1, 1]} : vector<16x32xf32> to vector<8x8xf32>
    %56 = vector.extract_strided_slice %9 {offsets = [0, 16], sizes = [8, 8], strides = [1, 1]} : vector<16x32xf32> to vector<8x8xf32>
    %57 = vector.extract_strided_slice %12 {offsets = [0, 16], sizes = [8, 8], strides = [1, 1]} : vector<16x32xf32> to vector<8x8xf32>
    %58 = tpu.transpose %56, [1, 0] : vector<8x8xf32> -> vector<8x8xf32>
    %cst_28 = arith.constant dense<0.000000e+00> : vector<8x8xf32>
    %59 = tpu.matmul %55, %58, %cst_28 {dimension_numbers = #tpu.dot_dimension_numbers<[1], [0], [0], [1], [0, 0, 1, 1], [], []>} : vector<8x8xf32>, vector<8x8xf32>, vector<8x8xf32> -> vector<8x8xf32>
    %60 = vector.extract_strided_slice %3 {offsets = [0, 2, 0, 0], sizes = [1, 1, 8, 8], strides = [1, 1, 1, 1]} : vector<2x4x8x8xf32> to vector<1x1x8x8xf32>
    %61 = vector.shape_cast %60 : vector<1x1x8x8xf32> to vector<8x8xf32>
    %62 = arith.addf %59, %61 : vector<8x8xf32>
    %cst_29 = arith.constant 0.176776692 : f32
    %63 = vector.broadcast %cst_29 : f32 to vector<8x8xf32>
    %64 = arith.mulf %62, %63 : vector<8x8xf32>
    %cst_30 = arith.constant dense<0xFF800000> : vector<8xf32>
    %65 = vector.multi_reduction <maximumf>, %64, %cst_30 [1] : vector<8x8xf32> to vector<8xf32>
    %66 = vector.shape_cast %65 : vector<8xf32> to vector<8x1xf32>
    %67 = vector.broadcast %66 : vector<8x1xf32> to vector<8x8xf32>
    %68 = arith.subf %64, %67 : vector<8x8xf32>
    %69 = math.exp %68 : vector<8x8xf32>
    %cst_31 = arith.constant dense<0.000000e+00> : vector<8xf32>
    %70 = vector.multi_reduction <add>, %69, %cst_31 [1] : vector<8x8xf32> to vector<8xf32>
    %71 = vector.shape_cast %70 : vector<8xf32> to vector<8x1xf32>
    %72 = tpu.reciprocal %71 {approx = true} : vector<8x1xf32> -> vector<8x1xf32>
    %73 = vector.broadcast %72 : vector<8x1xf32> to vector<8x8xf32>
    %74 = arith.mulf %69, %73 : vector<8x8xf32>
    %cst_32 = arith.constant dense<0.000000e+00> : vector<8x8xf32>
    %75 = tpu.matmul %74, %57, %cst_32 {dimension_numbers = #tpu.dot_dimension_numbers<[1], [0], [0], [1], [0, 0, 1, 1], [], []>} : vector<8x8xf32>, vector<8x8xf32>, vector<8x8xf32> -> vector<8x8xf32>
    %76 = vector.extract_strided_slice %6 {offsets = [0, 24], sizes = [8, 8], strides = [1, 1]} : vector<16x32xf32> to vector<8x8xf32>
    %77 = vector.extract_strided_slice %9 {offsets = [0, 24], sizes = [8, 8], strides = [1, 1]} : vector<16x32xf32> to vector<8x8xf32>
    %78 = vector.extract_strided_slice %12 {offsets = [0, 24], sizes = [8, 8], strides = [1, 1]} : vector<16x32xf32> to vector<8x8xf32>
    %79 = tpu.transpose %77, [1, 0] : vector<8x8xf32> -> vector<8x8xf32>
    %cst_33 = arith.constant dense<0.000000e+00> : vector<8x8xf32>
    %80 = tpu.matmul %76, %79, %cst_33 {dimension_numbers = #tpu.dot_dimension_numbers<[1], [0], [0], [1], [0, 0, 1, 1], [], []>} : vector<8x8xf32>, vector<8x8xf32>, vector<8x8xf32> -> vector<8x8xf32>
    %81 = vector.extract_strided_slice %3 {offsets = [0, 3, 0, 0], sizes = [1, 1, 8, 8], strides = [1, 1, 1, 1]} : vector<2x4x8x8xf32> to vector<1x1x8x8xf32>
    %82 = vector.shape_cast %81 : vector<1x1x8x8xf32> to vector<8x8xf32>
    %83 = arith.addf %80, %82 : vector<8x8xf32>
    %cst_34 = arith.constant 0.176776692 : f32
    %84 = vector.broadcast %cst_34 : f32 to vector<8x8xf32>
    %85 = arith.mulf %83, %84 : vector<8x8xf32>
    %cst_35 = arith.constant dense<0xFF800000> : vector<8xf32>
    %86 = vector.multi_reduction <maximumf>, %85, %cst_35 [1] : vector<8x8xf32> to vector<8xf32>
    %87 = vector.shape_cast %86 : vector<8xf32> to vector<8x1xf32>
    %88 = vector.broadcast %87 : vector<8x1xf32> to vector<8x8xf32>
    %89 = arith.subf %85, %88 : vector<8x8xf32>
    %90 = math.exp %89 : vector<8x8xf32>
    %cst_36 = arith.constant dense<0.000000e+00> : vector<8xf32>
    %91 = vector.multi_reduction <add>, %90, %cst_36 [1] : vector<8x8xf32> to vector<8xf32>
    %92 = vector.shape_cast %91 : vector<8xf32> to vector<8x1xf32>
    %93 = tpu.reciprocal %92 {approx = true} : vector<8x1xf32> -> vector<8x1xf32>
    %94 = vector.broadcast %93 : vector<8x1xf32> to vector<8x8xf32>
    %95 = arith.mulf %90, %94 : vector<8x8xf32>
    %cst_37 = arith.constant dense<0.000000e+00> : vector<8x8xf32>
    %96 = tpu.matmul %95, %78, %cst_37 {dimension_numbers = #tpu.dot_dimension_numbers<[1], [0], [0], [1], [0, 0, 1, 1], [], []>} : vector<8x8xf32>, vector<8x8xf32>, vector<8x8xf32> -> vector<8x8xf32>
    %97 = tpu.concatenate %33, %54, %75, %96 in 1 : vector<8x8xf32>, vector<8x8xf32>, vector<8x8xf32>, vector<8x8xf32> -> vector<8x32xf32>
    %98 = vector.extract_strided_slice %6 {offsets = [8, 0], sizes = [8, 8], strides = [1, 1]} : vector<16x32xf32> to vector<8x8xf32>
    %99 = vector.extract_strided_slice %9 {offsets = [8, 0], sizes = [8, 8], strides = [1, 1]} : vector<16x32xf32> to vector<8x8xf32>
    %100 = vector.extract_strided_slice %12 {offsets = [8, 0], sizes = [8, 8], strides = [1, 1]} : vector<16x32xf32> to vector<8x8xf32>
    %101 = tpu.transpose %99, [1, 0] : vector<8x8xf32> -> vector<8x8xf32>
    %cst_38 = arith.constant dense<0.000000e+00> : vector<8x8xf32>
    %102 = tpu.matmul %98, %101, %cst_38 {dimension_numbers = #tpu.dot_dimension_numbers<[1], [0], [0], [1], [0, 0, 1, 1], [], []>} : vector<8x8xf32>, vector<8x8xf32>, vector<8x8xf32> -> vector<8x8xf32>
    %103 = vector.extract_strided_slice %3 {offsets = [1, 0, 0, 0], sizes = [1, 1, 8, 8], strides = [1, 1, 1, 1]} : vector<2x4x8x8xf32> to vector<1x1x8x8xf32>
    %104 = vector.shape_cast %103 : vector<1x1x8x8xf32> to vector<8x8xf32>
    %105 = arith.addf %102, %104 : vector<8x8xf32>
    %cst_39 = arith.constant 0.176776692 : f32
    %106 = vector.broadcast %cst_39 : f32 to vector<8x8xf32>
    %107 = arith.mulf %105, %106 : vector<8x8xf32>
    %cst_40 = arith.constant dense<0xFF800000> : vector<8xf32>
    %108 = vector.multi_reduction <maximumf>, %107, %cst_40 [1] : vector<8x8xf32> to vector<8xf32>
    %109 = vector.shape_cast %108 : vector<8xf32> to vector<8x1xf32>
    %110 = vector.broadcast %109 : vector<8x1xf32> to vector<8x8xf32>
    %111 = arith.subf %107, %110 : vector<8x8xf32>
    %112 = math.exp %111 : vector<8x8xf32>
    %cst_41 = arith.constant dense<0.000000e+00> : vector<8xf32>
    %113 = vector.multi_reduction <add>, %112, %cst_41 [1] : vector<8x8xf32> to vector<8xf32>
    %114 = vector.shape_cast %113 : vector<8xf32> to vector<8x1xf32>
    %115 = tpu.reciprocal %114 {approx = true} : vector<8x1xf32> -> vector<8x1xf32>
    %116 = vector.broadcast %115 : vector<8x1xf32> to vector<8x8xf32>
    %117 = arith.mulf %112, %116 : vector<8x8xf32>
    %cst_42 = arith.constant dense<0.000000e+00> : vector<8x8xf32>
    %118 = tpu.matmul %117, %100, %cst_42 {dimension_numbers = #tpu.dot_dimension_numbers<[1], [0], [0], [1], [0, 0, 1, 1], [], []>} : vector<8x8xf32>, vector<8x8xf32>, vector<8x8xf32> -> vector<8x8xf32>
    %119 = vector.extract_strided_slice %6 {offsets = [8, 8], sizes = [8, 8], strides = [1, 1]} : vector<16x32xf32> to vector<8x8xf32>
    %120 = vector.extract_strided_slice %9 {offsets = [8, 8], sizes = [8, 8], strides = [1, 1]} : vector<16x32xf32> to vector<8x8xf32>
    %121 = vector.extract_strided_slice %12 {offsets = [8, 8], sizes = [8, 8], strides = [1, 1]} : vector<16x32xf32> to vector<8x8xf32>
    %122 = tpu.transpose %120, [1, 0] : vector<8x8xf32> -> vector<8x8xf32>
    %cst_43 = arith.constant dense<0.000000e+00> : vector<8x8xf32>
    %123 = tpu.matmul %119, %122, %cst_43 {dimension_numbers = #tpu.dot_dimension_numbers<[1], [0], [0], [1], [0, 0, 1, 1], [], []>} : vector<8x8xf32>, vector<8x8xf32>, vector<8x8xf32> -> vector<8x8xf32>
    %124 = vector.extract_strided_slice %3 {offsets = [1, 1, 0, 0], sizes = [1, 1, 8, 8], strides = [1, 1, 1, 1]} : vector<2x4x8x8xf32> to vector<1x1x8x8xf32>
    %125 = vector.shape_cast %124 : vector<1x1x8x8xf32> to vector<8x8xf32>
    %126 = arith.addf %123, %125 : vector<8x8xf32>
    %cst_44 = arith.constant 0.176776692 : f32
    %127 = vector.broadcast %cst_44 : f32 to vector<8x8xf32>
    %128 = arith.mulf %126, %127 : vector<8x8xf32>
    %cst_45 = arith.constant dense<0xFF800000> : vector<8xf32>
    %129 = vector.multi_reduction <maximumf>, %128, %cst_45 [1] : vector<8x8xf32> to vector<8xf32>
    %130 = vector.shape_cast %129 : vector<8xf32> to vector<8x1xf32>
    %131 = vector.broadcast %130 : vector<8x1xf32> to vector<8x8xf32>
    %132 = arith.subf %128, %131 : vector<8x8xf32>
    %133 = math.exp %132 : vector<8x8xf32>
    %cst_46 = arith.constant dense<0.000000e+00> : vector<8xf32>
    %134 = vector.multi_reduction <add>, %133, %cst_46 [1] : vector<8x8xf32> to vector<8xf32>
    %135 = vector.shape_cast %134 : vector<8xf32> to vector<8x1xf32>
    %136 = tpu.reciprocal %135 {approx = true} : vector<8x1xf32> -> vector<8x1xf32>
    %137 = vector.broadcast %136 : vector<8x1xf32> to vector<8x8xf32>
    %138 = arith.mulf %133, %137 : vector<8x8xf32>
    %cst_47 = arith.constant dense<0.000000e+00> : vector<8x8xf32>
    %139 = tpu.matmul %138, %121, %cst_47 {dimension_numbers = #tpu.dot_dimension_numbers<[1], [0], [0], [1], [0, 0, 1, 1], [], []>} : vector<8x8xf32>, vector<8x8xf32>, vector<8x8xf32> -> vector<8x8xf32>
    %140 = vector.extract_strided_slice %6 {offsets = [8, 16], sizes = [8, 8], strides = [1, 1]} : vector<16x32xf32> to vector<8x8xf32>
    %141 = vector.extract_strided_slice %9 {offsets = [8, 16], sizes = [8, 8], strides = [1, 1]} : vector<16x32xf32> to vector<8x8xf32>
    %142 = vector.extract_strided_slice %12 {offsets = [8, 16], sizes = [8, 8], strides = [1, 1]} : vector<16x32xf32> to vector<8x8xf32>
    %143 = tpu.transpose %141, [1, 0] : vector<8x8xf32> -> vector<8x8xf32>
    %cst_48 = arith.constant dense<0.000000e+00> : vector<8x8xf32>
    %144 = tpu.matmul %140, %143, %cst_48 {dimension_numbers = #tpu.dot_dimension_numbers<[1], [0], [0], [1], [0, 0, 1, 1], [], []>} : vector<8x8xf32>, vector<8x8xf32>, vector<8x8xf32> -> vector<8x8xf32>
    %145 = vector.extract_strided_slice %3 {offsets = [1, 2, 0, 0], sizes = [1, 1, 8, 8], strides = [1, 1, 1, 1]} : vector<2x4x8x8xf32> to vector<1x1x8x8xf32>
    %146 = vector.shape_cast %145 : vector<1x1x8x8xf32> to vector<8x8xf32>
    %147 = arith.addf %144, %146 : vector<8x8xf32>
    %cst_49 = arith.constant 0.176776692 : f32
    %148 = vector.broadcast %cst_49 : f32 to vector<8x8xf32>
    %149 = arith.mulf %147, %148 : vector<8x8xf32>
    %cst_50 = arith.constant dense<0xFF800000> : vector<8xf32>
    %150 = vector.multi_reduction <maximumf>, %149, %cst_50 [1] : vector<8x8xf32> to vector<8xf32>
    %151 = vector.shape_cast %150 : vector<8xf32> to vector<8x1xf32>
    %152 = vector.broadcast %151 : vector<8x1xf32> to vector<8x8xf32>
    %153 = arith.subf %149, %152 : vector<8x8xf32>
    %154 = math.exp %153 : vector<8x8xf32>
    %cst_51 = arith.constant dense<0.000000e+00> : vector<8xf32>
    %155 = vector.multi_reduction <add>, %154, %cst_51 [1] : vector<8x8xf32> to vector<8xf32>
    %156 = vector.shape_cast %155 : vector<8xf32> to vector<8x1xf32>
    %157 = tpu.reciprocal %156 {approx = true} : vector<8x1xf32> -> vector<8x1xf32>
    %158 = vector.broadcast %157 : vector<8x1xf32> to vector<8x8xf32>
    %159 = arith.mulf %154, %158 : vector<8x8xf32>
    %cst_52 = arith.constant dense<0.000000e+00> : vector<8x8xf32>
    %160 = tpu.matmul %159, %142, %cst_52 {dimension_numbers = #tpu.dot_dimension_numbers<[1], [0], [0], [1], [0, 0, 1, 1], [], []>} : vector<8x8xf32>, vector<8x8xf32>, vector<8x8xf32> -> vector<8x8xf32>
    %161 = vector.extract_strided_slice %6 {offsets = [8, 24], sizes = [8, 8], strides = [1, 1]} : vector<16x32xf32> to vector<8x8xf32>
    %162 = vector.extract_strided_slice %9 {offsets = [8, 24], sizes = [8, 8], strides = [1, 1]} : vector<16x32xf32> to vector<8x8xf32>
    %163 = vector.extract_strided_slice %12 {offsets = [8, 24], sizes = [8, 8], strides = [1, 1]} : vector<16x32xf32> to vector<8x8xf32>
    %164 = tpu.transpose %162, [1, 0] : vector<8x8xf32> -> vector<8x8xf32>
    %cst_53 = arith.constant dense<0.000000e+00> : vector<8x8xf32>
    %165 = tpu.matmul %161, %164, %cst_53 {dimension_numbers = #tpu.dot_dimension_numbers<[1], [0], [0], [1], [0, 0, 1, 1], [], []>} : vector<8x8xf32>, vector<8x8xf32>, vector<8x8xf32> -> vector<8x8xf32>
    %166 = vector.extract_strided_slice %3 {offsets = [1, 3, 0, 0], sizes = [1, 1, 8, 8], strides = [1, 1, 1, 1]} : vector<2x4x8x8xf32> to vector<1x1x8x8xf32>
    %167 = vector.shape_cast %166 : vector<1x1x8x8xf32> to vector<8x8xf32>
    %168 = arith.addf %165, %167 : vector<8x8xf32>
    %cst_54 = arith.constant 0.176776692 : f32
    %169 = vector.broadcast %cst_54 : f32 to vector<8x8xf32>
    %170 = arith.mulf %168, %169 : vector<8x8xf32>
    %cst_55 = arith.constant dense<0xFF800000> : vector<8xf32>
    %171 = vector.multi_reduction <maximumf>, %170, %cst_55 [1] : vector<8x8xf32> to vector<8xf32>
    %172 = vector.shape_cast %171 : vector<8xf32> to vector<8x1xf32>
    %173 = vector.broadcast %172 : vector<8x1xf32> to vector<8x8xf32>
    %174 = arith.subf %170, %173 : vector<8x8xf32>
    %175 = math.exp %174 : vector<8x8xf32>
    %cst_56 = arith.constant dense<0.000000e+00> : vector<8xf32>
    %176 = vector.multi_reduction <add>, %175, %cst_56 [1] : vector<8x8xf32> to vector<8xf32>
    %177 = vector.shape_cast %176 : vector<8xf32> to vector<8x1xf32>
    %178 = tpu.reciprocal %177 {approx = true} : vector<8x1xf32> -> vector<8x1xf32>
    %179 = vector.broadcast %178 : vector<8x1xf32> to vector<8x8xf32>
    %180 = arith.mulf %175, %179 : vector<8x8xf32>
    %cst_57 = arith.constant dense<0.000000e+00> : vector<8x8xf32>
    %181 = tpu.matmul %180, %163, %cst_57 {dimension_numbers = #tpu.dot_dimension_numbers<[1], [0], [0], [1], [0, 0, 1, 1], [], []>} : vector<8x8xf32>, vector<8x8xf32>, vector<8x8xf32> -> vector<8x8xf32>
    %182 = tpu.concatenate %118, %139, %160, %181 in 1 : vector<8x8xf32>, vector<8x8xf32>, vector<8x8xf32>, vector<8x8xf32> -> vector<8x32xf32>
    %183 = tpu.concatenate %97, %182 in 0 : vector<8x32xf32>, vector<8x32xf32> -> vector<16x32xf32>
    %c0_58 = arith.constant 0 : index
    %c0_59 = arith.constant 0 : index
    %184 = vector.load %arg8[%c0_58, %c0_59] : memref<6x32xf32, #tpu.memory_space<vmem>>, vector<6x32xf32>
    %185 = vector.extract_strided_slice %184 {offsets = [0, 0], sizes = [1, 32], strides = [1, 1]} : vector<6x32xf32> to vector<1x32xf32>
    %186 = vector.extract_strided_slice %184 {offsets = [1, 0], sizes = [1, 32], strides = [1, 1]} : vector<6x32xf32> to vector<1x32xf32>
    %187 = vector.extract_strided_slice %184 {offsets = [2, 0], sizes = [1, 32], strides = [1, 1]} : vector<6x32xf32> to vector<1x32xf32>
    %188 = vector.extract_strided_slice %184 {offsets = [3, 0], sizes = [1, 32], strides = [1, 1]} : vector<6x32xf32> to vector<1x32xf32>
    %189 = vector.extract_strided_slice %184 {offsets = [4, 0], sizes = [1, 32], strides = [1, 1]} : vector<6x32xf32> to vector<1x32xf32>
    %190 = vector.extract_strided_slice %184 {offsets = [5, 0], sizes = [1, 32], strides = [1, 1]} : vector<6x32xf32> to vector<1x32xf32>
    %c3 = arith.constant 3 : index
    %c0_60 = arith.constant 0 : index
    %c0_61 = arith.constant 0 : index
    %191 = vector.load %arg4[%c3, %c0_60, %c0_61] : memref<4x32x32xf32, #tpu.memory_space<vmem>>, vector<1x32x32xf32>
    %192 = vector.shape_cast %191 : vector<1x32x32xf32> to vector<32x32xf32>
    %cst_62 = arith.constant dense<0.000000e+00> : vector<16x32xf32>
    %193 = tpu.matmul %183, %192, %cst_62 {dimension_numbers = #tpu.dot_dimension_numbers<[1], [0], [0], [1], [0, 0, 1, 1], [], []>} : vector<16x32xf32>, vector<32x32xf32>, vector<16x32xf32> -> vector<16x32xf32>
    %194 = vector.broadcast %185 : vector<1x32xf32> to vector<16x32xf32>
    %195 = arith.addf %193, %194 : vector<16x32xf32>
    %196 = arith.addf %195, %0 : vector<16x32xf32>
    %cst_63 = arith.constant dense<0.000000e+00> : vector<16xf32>
    %197 = vector.multi_reduction <add>, %196, %cst_63 [1] : vector<16x32xf32> to vector<16xf32>
    %198 = vector.shape_cast %197 : vector<16xf32> to vector<16x1xf32>
    %cst_64 = arith.constant 3.200000e+01 : f32
    %199 = vector.broadcast %cst_64 : f32 to vector<16x1xf32>
    %200 = arith.divf %198, %199 : vector<16x1xf32>
    %201 = vector.broadcast %200 : vector<16x1xf32> to vector<16x32xf32>
    %202 = arith.subf %196, %201 : vector<16x32xf32>
    %203 = vector.broadcast %200 : vector<16x1xf32> to vector<16x32xf32>
    %204 = arith.subf %196, %203 : vector<16x32xf32>
    %205 = arith.mulf %202, %204 : vector<16x32xf32>
    %cst_65 = arith.constant dense<0.000000e+00> : vector<16xf32>
    %206 = vector.multi_reduction <add>, %205, %cst_65 [1] : vector<16x32xf32> to vector<16xf32>
    %207 = vector.shape_cast %206 : vector<16xf32> to vector<16x1xf32>
    %cst_66 = arith.constant 3.200000e+01 : f32
    %208 = vector.broadcast %cst_66 : f32 to vector<16x1xf32>
    %209 = arith.divf %207, %208 : vector<16x1xf32>
    %210 = vector.broadcast %200 : vector<16x1xf32> to vector<16x32xf32>
    %211 = arith.subf %196, %210 : vector<16x32xf32>
    %cst_67 = arith.constant 9.99999974E-6 : f32
    %212 = vector.broadcast %cst_67 : f32 to vector<16x1xf32>
    %213 = arith.addf %209, %212 : vector<16x1xf32>
    %214 = math.rsqrt %213 : vector<16x1xf32>
    %215 = vector.broadcast %214 : vector<16x1xf32> to vector<16x32xf32>
    %216 = arith.mulf %211, %215 : vector<16x32xf32>
    %217 = vector.broadcast %186 : vector<1x32xf32> to vector<16x32xf32>
    %218 = arith.mulf %216, %217 : vector<16x32xf32>
    %219 = vector.broadcast %187 : vector<1x32xf32> to vector<16x32xf32>
    %220 = arith.addf %218, %219 : vector<16x32xf32>
    %c0_68 = arith.constant 0 : index
    %c0_69 = arith.constant 0 : index
    %221 = vector.load %arg5[%c0_68, %c0_69] : memref<32x128xf32, #tpu.memory_space<vmem>>, vector<32x128xf32>
    %cst_70 = arith.constant dense<0.000000e+00> : vector<16x128xf32>
    %222 = tpu.matmul %220, %221, %cst_70 {dimension_numbers = #tpu.dot_dimension_numbers<[1], [0], [0], [1], [0, 0, 1, 1], [], []>} : vector<16x32xf32>, vector<32x128xf32>, vector<16x128xf32> -> vector<16x128xf32>
    %c0_71 = arith.constant 0 : index
    %c0_72 = arith.constant 0 : index
    %223 = vector.load %arg6[%c0_71, %c0_72] : memref<1x128xf32, #tpu.memory_space<vmem>>, vector<1x128xf32>
    %224 = vector.broadcast %223 : vector<1x128xf32> to vector<16x128xf32>
    %225 = arith.addf %222, %224 : vector<16x128xf32>
    %cst_73 = arith.constant 0.000000e+00 : f32
    %226 = vector.broadcast %cst_73 : f32 to vector<16x128xf32>
    %227 = arith.maximumf %225, %226 : vector<16x128xf32>
    %c0_74 = arith.constant 0 : index
    %c0_75 = arith.constant 0 : index
    %228 = vector.load %arg7[%c0_74, %c0_75] : memref<128x32xf32, #tpu.memory_space<vmem>>, vector<128x32xf32>
    %cst_76 = arith.constant dense<0.000000e+00> : vector<16x32xf32>
    %229 = tpu.matmul %227, %228, %cst_76 {dimension_numbers = #tpu.dot_dimension_numbers<[1], [0], [0], [1], [0, 0, 1, 1], [], []>} : vector<16x128xf32>, vector<128x32xf32>, vector<16x32xf32> -> vector<16x32xf32>
    %230 = vector.broadcast %188 : vector<1x32xf32> to vector<16x32xf32>
    %231 = arith.addf %229, %230 : vector<16x32xf32>
    %232 = arith.addf %231, %220 : vector<16x32xf32>
    %cst_77 = arith.constant dense<0.000000e+00> : vector<16xf32>
    %233 = vector.multi_reduction <add>, %232, %cst_77 [1] : vector<16x32xf32> to vector<16xf32>
    %234 = vector.shape_cast %233 : vector<16xf32> to vector<16x1xf32>
    %cst_78 = arith.constant 3.200000e+01 : f32
    %235 = vector.broadcast %cst_78 : f32 to vector<16x1xf32>
    %236 = arith.divf %234, %235 : vector<16x1xf32>
    %237 = vector.broadcast %236 : vector<16x1xf32> to vector<16x32xf32>
    %238 = arith.subf %232, %237 : vector<16x32xf32>
    %239 = vector.broadcast %236 : vector<16x1xf32> to vector<16x32xf32>
    %240 = arith.subf %232, %239 : vector<16x32xf32>
    %241 = arith.mulf %238, %240 : vector<16x32xf32>
    %cst_79 = arith.constant dense<0.000000e+00> : vector<16xf32>
    %242 = vector.multi_reduction <add>, %241, %cst_79 [1] : vector<16x32xf32> to vector<16xf32>
    %243 = vector.shape_cast %242 : vector<16xf32> to vector<16x1xf32>
    %cst_80 = arith.constant 3.200000e+01 : f32
    %244 = vector.broadcast %cst_80 : f32 to vector<16x1xf32>
    %245 = arith.divf %243, %244 : vector<16x1xf32>
    %246 = vector.broadcast %236 : vector<16x1xf32> to vector<16x32xf32>
    %247 = arith.subf %232, %246 : vector<16x32xf32>
    %cst_81 = arith.constant 9.99999974E-6 : f32
    %248 = vector.broadcast %cst_81 : f32 to vector<16x1xf32>
    %249 = arith.addf %245, %248 : vector<16x1xf32>
    %250 = math.rsqrt %249 : vector<16x1xf32>
    %251 = vector.broadcast %250 : vector<16x1xf32> to vector<16x32xf32>
    %252 = arith.mulf %247, %251 : vector<16x32xf32>
    %253 = vector.broadcast %189 : vector<1x32xf32> to vector<16x32xf32>
    %254 = arith.mulf %252, %253 : vector<16x32xf32>
    %255 = vector.broadcast %190 : vector<1x32xf32> to vector<16x32xf32>
    %256 = arith.addf %254, %255 : vector<16x32xf32>
    %c0_82 = arith.constant 0 : index
    %c0_83 = arith.constant 0 : index
    %257 = vector.load %arg9[%c0_82, %c0_83] : memref<16x32xf32, #tpu.memory_space<vmem>>, vector<16x32xf32>
    tpu.vector_store %arg9[%c0_82, %c0_83], %256 {strides = array<i32>} : memref<16x32xf32, #tpu.memory_space<vmem>>, vector<16x32xf32>,
    return
  }
}

</mosaic_0001>

<bundles_post_ra>
// kernel: tpu_custom_call.1
= control target key start
LH: loop header
LB: loop body
LE: loop exit
PB: predicated region body
PF: predicated region fallthrough
CT: control target
= control target key end

     0   :  { %14 = vsyncpa [#allocation3], 0  ;;  %s1643_s0 = inlined_call_operand.hbm [shape: f32[16,32], index: 0, kind: input, shape index: {}]   ;;  %s1644_s1 = inlined_call_operand.hbm [shape: f32[16,32], index: 1, kind: input, shape index: {}]   ;;  %s1645_s2 = inlined_call_operand.hbm [shape: f32[16,32], index: 2, kind: input, shape index: {}]   ;;  %s1646_s3 = inlined_call_operand.hbm [shape: f32[2,4,8,8], index: 3, kind: input, shape index: {}]   ;;  %s1647_s4 = inlined_call_operand.vmem [shape: f32[4,32,32], index: 4, kind: input, shape index: {}]   ;;  %s1648_s5 = inlined_call_operand.vmem [shape: f32[32,128], index: 5, kind: input, shape index: {}]   ;;  %s1649_s6 = inlined_call_operand.vmem [shape: f32[1,128], index: 6, kind: input, shape index: {}]   ;;  %s1650_s7 = inlined_call_operand.vmem [shape: f32[128,32], index: 7, kind: input, shape index: {}]   ;;  %s1651_s8 = inlined_call_operand.hbm [shape: f32[6,32], index: 8, kind: input, shape index: {}]   ;;  %s1652_s9 = inlined_call_operand.hbm [shape: f32[16,32], index: 9, kind: output, shape index: {}]  }
   0x1   :  { %15 = vsyncpa [#allocation6], 0 }
   0x2   :  { %16 = vsyncpa [#allocation9], 0 }
   0x3   :  { %17 = vsyncpa [#allocation4], 0  ;;  %s35_s11 = sshll.u32 %s1644_s1, 4  ;;  %s1282_s12 = smov [#allocation5]   ;;  %s36_s11 = int_to_ptr.hbm [resolvable:$true] %s35_s11 }
   0x4   :  { %s37_s13 = sshll.u32 %s1282_s12, 4  ;;  %s61_s16 = sshll.u32 %s1646_s3, 4  ;;  %s38_s13 = int_to_ptr.vmem [resolvable:$true] %s37_s13  ;;  %s62_s16 = int_to_ptr.hbm [resolvable:$true] %s61_s16 }
   0x5   :  { %s1283_s17 = smov 128   ;;  %s1284_s18 = smov 8  }
   0x6   :  { %43 = dma.hbm_to_vmem [thread:$0]  %s36_s11, 256, %s38_s13, [#allocation6], %s1283_s17, %s1283_s17, %s1284_s18  }
   0x7   :  { %s1285_s19 = smov [#allocation8]   ;;  %s22_s1 = sshll.u32 %s1643_s0, 4  ;;  %s23_s1 = int_to_ptr.hbm [resolvable:$true] %s22_s1 }
   0x8   :  { %s63_s20 = sshll.u32 %s1285_s19, 4  ;;  %s48_s24 = sshll.u32 %s1645_s2, 4  ;;  %s64_s20 = int_to_ptr.vmem [resolvable:$true] %s63_s20  ;;  %s49_s24 = int_to_ptr.hbm [resolvable:$true] %s48_s24 }
   0x9   :  { %69 = dma.hbm_to_vmem [thread:$0]  %s62_s16, 1024, %s64_s20, [#allocation9], %s1283_s17, %s1283_s17, %s1284_s18  }
   0xa   :  { %s1286_s25 = smov [#allocation2]   ;;  %s1287_s27 = smov [#allocation7]  }
   0xb   :  { %s24_s26 = sshll.u32 %s1286_s25, 4  ;;  %s50_s0 = sshll.u32 %s1287_s27, 4  ;;  %s25_s26 = int_to_ptr.vmem [resolvable:$true] %s24_s26  ;;  %s51_s0 = int_to_ptr.vmem [resolvable:$true] %s50_s0 }
   0xc   :  { %30 = dma.hbm_to_vmem [thread:$0]  %s23_s1, 256, %s25_s26, [#allocation3], %s1283_s17, %s1283_s17, %s1284_s18  }
   0xd   :  { %s83_s30 = sshll.u32 %s1651_s8, 4  ;;  %s1288_s2 = smov [#allocation10]   ;;  %s84_s30 = int_to_ptr.hbm [resolvable:$true] %s83_s30 }
   0xe   :  { %56 = dma.hbm_to_vmem [thread:$0]  %s49_s24, 256, %s51_s0, [#allocation6], %s1283_s17, %s1283_s17, %s1284_s18  }
   0xf   :  { %s85_s10 = sshll.u32 %s1288_s2, 4  ;;  %s86_s10 = int_to_ptr.vmem [resolvable:$true] %s85_s10 }
  0x10   :  { %88 = dma.hbm_to_vmem [thread:$0]  %s84_s30, 128, %s86_s10, [#allocation9]  }
  0x11   :  { %1274 = dma.done.wait [#allocation3], 256  }
  0x12   :  { %1275 = vsyncadd [#allocation3], 4294967040 }
  0x13   :  { %1276 = dma.done.wait [#allocation6], 512  }
  0x14   :  { %1277 = vsyncadd [#allocation6], 4294966784 }
  0x15   :  { %1278 = dma.done.wait [#allocation9], 1152  }
  0x16   :  { %1279 = vsyncadd [#allocation9], 4294966144  ;;  %v1032_v0 = vld [vmem:[%s1647_s4 + $0x38] sm:$0xff]  ;;  %v1031_v1 = vld [vmem:[%s1647_s4 + $0x30] sm:$0xff]  ;;  %vm127_vm0 = vcmask 261120   ;;  %vm225_vm1 = vcmask 64512  }
  0x17   :  { %v126_v2 = vld [vmem:[%s1647_s4 + $0x18] sm:$0xff]  ;;  %180 = vmatpush.msra.mxu1 %v1032_v0  ;;  %v125_v3 = vld [vmem:[%s1647_s4 + $0x10] sm:$0xff]  ;;  %v1030_v4 = vld [vmem:[%s1647_s4 + $0x28] sm:$0xff]  ;;  %s1289_s11 = smov 104   ;;  %s1290_s12 = smov 120   ;;  %vm499_vm2 = vcmask 130048  }
  0x18   :  { %146 = vmatpush.msra.mxu0 %v126_v2  ;;  %v124_v5 = vld [vmem:[%s1647_s4 + $0x8] sm:$0xff]  ;;  %v1029_v6 = vld [vmem:[%s1647_s4 + $0x20] sm:$0xff]  ;;  %v1038_v8 = vld [vmem:[%s1647_s4 + $0x58] sm:$0xff]  ;;  %s1291_s8 = smov 112   ;;  %s1292_s13 = smov 24   ;;  %vm501_vm3 = vcmask 195584  }
  0x19   :  { %181 = vmatpush.msra.mxu1 %v1031_v1  ;;  %v123_v7 = vld [vmem:[%s1647_s4] sm:$0xff]  ;;  %v111_v9 = vld [vmem:[#allocation5] sm:$0xff]  ;;  %214 = vmatpush.msra.mxu2 %v1038_v8  ;;  %v1036_v12 = vld [vmem:[%s1647_s4 + $0x48] sm:$0xff]  ;;  %s1293_s14 = smov 16   ;;  %s1012_s15 = sshll.u32 %s1652_s9, 4  ;;  %s1013_s15 = int_to_ptr.hbm [resolvable:$true] %s1012_s15 }
  0x1a   :  { %147 = vmatpush.msra.mxu0 %v125_v3  ;;  %v1400_v10 = vld [vmem:[#allocation2] sm:$0xff]  ;;  %v1037_v11 = vld [vmem:[%s1647_s4 + $0x50] sm:$0xff]  ;;  %v1414_v15 = vld [vmem:[#allocation2 + $0x8] sm:$0xff] }
  0x1b   :  { %182 = vmatpush.msra.mxu1 %v1030_v4  ;;  %215 = vmatpush.msra.mxu2 %v1037_v11  ;;  %v1035_v13 = vld [vmem:[%s1647_s4 + $0x40] sm:$0xff]  ;;  %v112_v16 = vld [vmem:[#allocation5 + $0x8] sm:$0xff]  ;;  %v115_v27 = vld [vmem:[#allocation8] sm:$0xff] }
  0x1c   :  { %148 = vmatpush.msra.mxu0 %v124_v5  ;;  %v113_v14 = vld [vmem:[#allocation7] sm:$0xff]  ;;  %v116_v35 = vld [vmem:[#allocation8 + $0x8] sm:$0xff]  ;;  %v118_v51 = vld [vmem:[#allocation8 + $0x18] sm:$0xff] }
  0x1d   :  { %183 = vmatpush.msra.mxu1 %v1029_v6  ;;  %216 = vmatpush.msra.mxu2 %v1036_v12  ;;  %v120_v46 = vld [vmem:[#allocation8 + $0x28] sm:$0xff] }
  0x1e   :  { %149 = vmatpush.msra.mxu0 %v123_v7  ;;  %1033 = vmatmul.msk.f32.vlgmr.msra.gmra.mxu1 %vm127_vm0, %v111_v9 }
  0x1f   :  { %1027 = vmatmul.msk.f32.vlgmr.msra.gmra.mxu0 %vm127_vm0, %v1400_v10  ;;  %217 = vmatpush.msra.mxu2 %v1035_v13 }
  0x20   :  { %1039 = vmatmul.msk.f32.vlgmr.msra.gmra.mxu2 %vm127_vm0, %v113_v14 }
  0x26   :  { %1034 = vmatmul.msk.f32.gmra.mxu1 %vm127_vm0, %v112_v16 }
  0x27   :  { %1028 = vmatmul.msk.f32.gmra.mxu0 %vm127_vm0, %v1414_v15 }
  0x9b   :  { %v185_v17 = vpop.f32.mrf.mxu1 }
  0x9c   :  { %422 = vrot.lane.b32.xlu2 %v185_v17, %s1289_s11  ;;  %289 = vrot.lane.b32.xlu1 %v185_v17, %s1290_s12  ;;  %v151_v18 = vpop.f32.mrf.mxu0 }
  0x9d   :  { %1041 = vmatpush.xpose.msk.msrb.mxu0 %vm225_vm1, %v185_v17 }
  0xa0   :  { %1042 = vmatmul.msk.f32.vlgmr.msrb.gmra.mxu0 %vm225_vm1, %v151_v18 }
  0xa3   :  { %v1426_v19 = vpop.f32.mrf.mxu1  ;;  %v1441_v21 = vpop.f32.mrf.mxu2 }
  0xa4   :  { %356 = vrot.lane.b32.xlu1 %v185_v17, %s1291_s8  ;;  %287 = vrot.lane.b32.xlu2 %v151_v18, %s1290_s12  ;;  %v1431_v20 = vpop.f32.mrf.mxu0  ;;  %v122_v17 = vld [vmem:[#allocation8 + $0x38] sm:$0xff] }
  0xa5   :  { %282 = vmatpush.msrb.mxu1 %v1441_v21 }
  0xac   :  { %420 = vrot.lane.b32.xlu1 %v151_v18, %s1289_s11  ;;  %566 = vrot.lane.b32.xlu2 %v1426_v19, %s1290_s12 }
  0xb4   :  { %564 = vrot.lane.b32.xlu1 %v1431_v20, %s1290_s12  ;;  %633 = vrot.lane.b32.xlu2 %v1426_v19, %s1291_s8 }
  0xbc   :  { %631 = vrot.lane.b32.xlu2 %v1431_v20, %s1291_s8  ;;  %699 = vrot.lane.b32.xlu1 %v1426_v19, %s1289_s11 }
  0xf6   :  { %v423_v22 = vpop.permute.xlu2 %422 }
  0xf7   :  { %1050 = vmatpush.xpose.msk.msra.mxu3 %vm225_vm1, %v423_v22 }
  0xfe   :  { %v288_v23 = vpop.permute.xlu2 %287 }
 0x106   :  { %v567_v24 = vpop.permute.xlu2 %566 }
 0x107   :  { %1056 = vmatpush.xpose.msk.msrb.mxu3 %vm225_vm1, %v567_v24  ;;  %v117_v24 = vld [vmem:[#allocation8 + $0x10] sm:$0xff] }
 0x10e   :  { %v290_v25 = vpop.permute.xlu1 %289  ;;  %v634_v3 = vpop.permute.xlu2 %633 }
 0x10f   :  { %1044 = vmatpush.xpose.msk.msra.mxu0 %vm225_vm1, %v290_v25 }
 0x112   :  { %1045 = vmatmul.msk.f32.vlgmr.msra.gmra.mxu0 %vm225_vm1, %v288_v23 }
 0x116   :  { %v357_v26 = vpop.permute.xlu1 %356  ;;  %v632_v7 = vpop.permute.xlu2 %631 }
 0x117   :  { %1047 = vmatpush.xpose.msk.msra.mxu1 %vm225_vm1, %v357_v26 }
 0x11d   :  { %v249_v28 = vpop.f32.mrf.mxu0 }
 0x11e   :  { %v250_v29 = vadd.f32 %v249_v28, %v115_v27  ;;  %v421_v30 = vpop.permute.xlu1 %420  ;;  %v121_v28 = vld [vmem:[#allocation8 + $0x30] sm:$0xff] }
 0x11f   :  { %1051 = vmatmul.msk.f32.vlgmr.msra.gmra.mxu3 %vm225_vm1, %v421_v30 }
 0x120   :  { %v252_v31 = vmul.f32 0.17677669, %v250_v29 }
 0x122   :  { %v253_v32 = vsel %vm225_vm1, %v252_v31, -inf }
 0x123   :  { %254 = vmax.xlane.f32.xlu0 %v253_v32 }
 0x126   :  { %v565_v33 = vpop.permute.xlu1 %564 }
 0x127   :  { %1057 = vmatmul.msk.f32.vlgmr.msrb.gmra.mxu3 %vm225_vm1, %v565_v33  ;;  %v119_v33 = vld [vmem:[#allocation8 + $0x20] sm:$0xff] }
 0x12e   :  { %v700_v34 = vpop.permute.xlu1 %699 }
 0x12f   :  { %1062 = vmatpush.xpose.msk.msra.mxu3 %vm225_vm1, %v700_v34 }
 0x137   :  { %354 = vrot.lane.b32.xlu0 %v151_v18, %s1291_s8  ;;  %v114_v18 = vld [vmem:[#allocation7 + $0x8] sm:$0xff] }
 0x138   :  { %1040 = vmatmul.msk.f32.gmra.mxu2 %vm127_vm0, %v114_v18 }
 0x18f   :  { %v312_v36 = vpop.f32.mrf.mxu0 }
 0x190   :  { %v313_v37 = vadd.f32 %v312_v36, %v116_v35 }
 0x192   :  { %v315_v38 = vmul.f32 0.17677669, %v313_v37 }
 0x194   :  { %v316_v39 = vsel %vm225_vm1, %v315_v38, -inf }
 0x195   :  { %317 = vmax.xlane.f32.xlu1 %v316_v39 }
 0x196   :  { %v255_v40 = vpop.xlane.xlu0 %254 }
 0x197   :  { %v256_v41 = vsub.f32 %v252_v31, %v255_v40 }
 0x199   :  { %v257_v42 = vmul.f32 1.442695, %v256_v41 }
 0x19b   :  { %1088 = vpow2.f32 %v257_v42 }
 0x1a1   :  { %v1089_v43 = vpop.eup %1088 }
 0x1a2   :  { %v445_v44 = vpop.f32.mrf.mxu3  ;;  %v259_v45 = vsel %vm225_vm1, %v1089_v43, 0.0 }
 0x1a3   :  { %260 = vadd.xlane.f32.xlu0 %v259_v45  ;;  %v446_v52 = vadd.f32 %v445_v44, %v118_v51 }
 0x1a5   :  { %v1459_v53 = vmul.f32 0.17677669, %v446_v52 }
 0x1a7   :  { %v449_v54 = vsel %vm225_vm1, %v1459_v53, -inf }
 0x1a9   :  { %v355_v58 = vpop.permute.xlu0 %354 }
 0x1aa   :  { %v589_v47 = vpop.f32.mrf.mxu3 }
 0x1ab   :  { %v590_v48 = vadd.f32 %v589_v47, %v120_v46 }
 0x1ad   :  { %v592_v49 = vmul.f32 0.17677669, %v590_v48 }
 0x1af   :  { %v593_v50 = vsel %vm225_vm1, %v592_v49, -inf }
 0x1b0   :  { %594 = vmax.xlane.f32.xlu1 %v593_v50 }
 0x1b7   :  { %697 = vrot.lane.b32.xlu0 %v1431_v20, %s1289_s11 }
 0x1e1   :  { %450 = vmax.xlane.f32.xlu0 %v449_v54 }
 0x208   :  { %v318_v55 = vpop.xlane.xlu1 %317 }
 0x209   :  { %v319_v56 = vsub.f32 %v315_v38, %v318_v55 }
 0x20b   :  { %v320_v57 = vmul.f32 1.442695, %v319_v56 }
 0x20d   :  { %1090 = vpow2.f32 %v320_v57 }
 0x213   :  { %v1091_v59 = vpop.eup %1090 }
 0x214   :  { %v322_v60 = vsel %vm225_vm1, %v1091_v59, 0.0 }
 0x215   :  { %323 = vadd.xlane.f32.xlu1 %v322_v60 }
 0x216   :  { %v261_v61 = vpop.xlane.xlu0 %260 }
 0x217   :  { %1092 = vrcp.f32 %v261_v61 }
 0x21d   :  { %v1093_v62 = vpop.eup %1092 }
 0x21e   :  { %v263_v63 = vmul.f32 %v1093_v62, %v1089_v43 }
 0x220   :  { %1043 = vmatmul.msk.f32.vlgmr.msrb.gmra.mxu1 %vm225_vm1, %v263_v63 }
 0x221   :  { %1053 = vmatpush.xpose.msk.msrb.mxu1 %vm225_vm1, %v1426_v19 }
 0x223   :  { %v595_v0 = vpop.xlane.xlu1 %594 }
 0x224   :  { %v596_v1 = vsub.f32 %v592_v49, %v595_v0 }
 0x226   :  { %v597_v2 = vmul.f32 1.442695, %v596_v1  ;;  %v222_v1 = vpop.f32.mrf.mxu2 }
 0x228   :  { %1094 = vpow2.f32 %v597_v2  ;;  %1048 = vmatmul.msk.f32.vlgmr.msra.gmra.mxu1 %vm225_vm1, %v355_v58 }
 0x229   :  { %1059 = vmatpush.xpose.msk.msra.mxu1 %vm225_vm1, %v634_v3  ;;  %v698_v4 = vpop.permute.xlu0 %697 }
 0x22a   :  { %1063 = vmatmul.msk.f32.vlgmr.msra.gmra.mxu3 %vm225_vm1, %v698_v4 }
 0x22e   :  { %v1470_v5 = vpop.eup %1094  ;;  %328 = vrot.lane.b32.xlu1 %v1441_v21, %s1290_s12 }
 0x22f   :  { %v599_v6 = vsel %vm225_vm1, %v1470_v5, 0.0 }
 0x230   :  { %1054 = vmatmul.msk.f32.vlgmr.msrb.gmra.mxu1 %vm225_vm1, %v1431_v20  ;;  %600 = vadd.xlane.f32.xlu0 %v599_v6 }
 0x238   :  { %1060 = vmatmul.msk.f32.vlgmr.msra.gmra.mxu1 %vm225_vm1, %v632_v7 }
 0x244   :  { %460 = vrot.lane.b32.xlu0 %v1441_v21, %s1289_s11 }
 0x254   :  { %v451_v16 = vpop.xlane.xlu0 %450 }
 0x255   :  { %v452_v35 = vsub.f32 %v1459_v53, %v451_v16 }
 0x257   :  { %v453_v39 = vmul.f32 1.442695, %v452_v35  ;;  %v1065_v35 = vld [vmem:[%s1647_s4 + $0x60] sm:$0xff] }
 0x288   :  { %v324_v8 = vpop.xlane.xlu1 %323 }
 0x289   :  { %1096 = vrcp.f32 %v324_v8 }
 0x28a   :  { %1098 = vpow2.f32 %v453_v39 }
 0x28f   :  { %v1097_v9 = vpop.eup %1096 }
 0x290   :  { %v326_v12 = vmul.f32 %v1097_v9, %v1091_v59  ;;  %v1099_v42 = vpop.eup %1098 }
 0x291   :  { %v455_v43 = vsel %vm225_vm1, %v1099_v42, 0.0 }
 0x29d   :  { %v1481_v11 = vpop.f32.mrf.mxu1 }
 0x2a0   :  { %v329_v13 = vpop.permute.xlu1 %328 }
 0x2a1   :  { %349 = vmatpush.msrb.mxu0 %v329_v13 }
 0x2a2   :  { %1046 = vmatmul.msk.f32.vlgmr.msrb.gmra.mxu0 %vm225_vm1, %v326_v12 }
 0x2a3   :  { %v1485_v22 = vpop.xlane.xlu0 %600 }
 0x2a5   :  { %v379_v14 = vpop.f32.mrf.mxu1 }
 0x2a6   :  { %v380_v26 = vadd.f32 %v379_v14, %v117_v24 }
 0x2a8   :  { %v382_v30 = vmul.f32 0.17677669, %v380_v26 }
 0x2aa   :  { %v383_v38 = vsel %vm225_vm1, %v382_v30, -inf }
 0x2ad   :  { %v526_v19 = vpop.f32.mrf.mxu1  ;;  %v722_v20 = vpop.f32.mrf.mxu3 }
 0x2ae   :  { %v723_v23 = vadd.f32 %v722_v20, %v122_v17  ;;  %v527_v36 = vadd.f32 %v526_v19, %v119_v33  ;;  %v1067_v33 = vld [vmem:[%s1647_s4 + $0x70] sm:$0xff] }
 0x2b0   :  { %v725_v25 = vmul.f32 0.17677669, %v723_v23  ;;  %v529_v40 = vmul.f32 0.17677669, %v527_v36 }
 0x2b2   :  { %v726_v27 = vsel %vm225_vm1, %v725_v25, -inf  ;;  %v530_v41 = vsel %vm225_vm1, %v529_v40, -inf }
 0x2b3   :  { %727 = vmax.xlane.f32.xlu2 %v726_v27 }
 0x2b5   :  { %v656_v29 = vpop.f32.mrf.mxu1 }
 0x2b6   :  { %v657_v31 = vadd.f32 %v656_v29, %v121_v28  ;;  %v461_v32 = vpop.permute.xlu0 %460 }
 0x2b7   :  { %481 = vmatpush.msra.mxu0 %v461_v32  ;;  %v1068_v32 = vld [vmem:[%s1647_s4 + $0x78] sm:$0xff] }
 0x2b8   :  { %v659_v34 = vmul.f32 0.17677669, %v657_v31  ;;  %803 = vmatpush.msrb.mxu1 %v1068_v32  ;;  %v925_v32 = vld [vmem:[%s1650_s7 + $0x68] sm:$0xff] }
 0x2ba   :  { %v660_v37 = vsel %vm225_vm1, %v659_v34, -inf  ;;  %804 = vmatpush.msrb.mxu1 %v1067_v33 }
 0x2bb   :  { %661 = vmax.xlane.f32.xlu0 %v660_v37  ;;  %384 = vmax.xlane.f32.xlu2 %v383_v38 }
 0x2c3   :  { %531 = vmax.xlane.f32.xlu2 %v530_v41 }
 0x2cb   :  { %456 = vadd.xlane.f32.xlu2 %v455_v43 }
 0x2e3   :  { %394 = vrot.lane.b32.xlu2 %v1441_v21, %s1291_s8 }
 0x31f   :  { %v351_v4 = vpop.f32.mrf.mxu0 }
 0x326   :  { %v728_v44 = vpop.xlane.xlu2 %727 }
 0x327   :  { %v729_v45 = vsub.f32 %v725_v25, %v728_v44 }
 0x329   :  { %v730_v46 = vmul.f32 1.442695, %v729_v45 }
 0x32b   :  { %1100 = vpow2.f32 %v730_v46 }
 0x32e   :  { %v385_v47 = vpop.xlane.xlu2 %384  ;;  %v662_v48 = vpop.xlane.xlu0 %661 }
 0x32f   :  { %v386_v49 = vsub.f32 %v382_v30, %v385_v47  ;;  %v663_v50 = vsub.f32 %v659_v34, %v662_v48  ;;  %v1066_v34 = vld [vmem:[%s1647_s4 + $0x68] sm:$0xff]  ;;  %v1533_v48 = vld [vmem:[#allocation10] sm:$0x3f] }
 0x330   :  { %805 = vmatpush.msrb.mxu1 %v1066_v34 }
 0x331   :  { %v1495_v51 = vpop.eup %1100  ;;  %v387_v52 = vmul.f32 1.442695, %v386_v49  ;;  %v664_v53 = vmul.f32 1.442695, %v663_v50  ;;  %v784_v49 = vperm.slane %v1533_v48, 0 }
 0x332   :  { %v732_v54 = vsel %vm225_vm1, %v1495_v51, 0.0  ;;  %806 = vmatpush.msrb.mxu1 %v1065_v35  ;;  %v924_v35 = vld [vmem:[%s1650_s7 + $0x60] sm:$0xff] }
 0x333   :  { %1102 = vpow2.f32 %v387_v52  ;;  %733 = vadd.xlane.f32.xlu2 %v732_v54 }
 0x334   :  { %1104 = vpow2.f32 %v664_v53 }
 0x336   :  { %v532_v55 = vpop.xlane.xlu2 %531 }
 0x337   :  { %v533_v21 = vsub.f32 %v529_v40, %v532_v55 }
 0x339   :  { %v1103_v56 = vpop.eup %1102  ;;  %v534_v57 = vmul.f32 1.442695, %v533_v21 }
 0x33a   :  { %v1105_v58 = vpop.eup %1104  ;;  %v389_v59 = vsel %vm225_vm1, %v1103_v56, 0.0 }
 0x33b   :  { %1106 = vpow2.f32 %v534_v57  ;;  %390 = vadd.xlane.f32.xlu0 %v389_v59  ;;  %v666_v60 = vsel %vm225_vm1, %v1105_v58, 0.0 }
 0x33c   :  { %667 = vadd.xlane.f32.xlu1 %v666_v60 }
 0x33e   :  { %v457_v61 = vpop.xlane.xlu2 %456 }
 0x33f   :  { %1108 = vrcp.f32 %v457_v61 }
 0x341   :  { %v1107_v62 = vpop.eup %1106 }
 0x342   :  { %v536_v63 = vsel %vm225_vm1, %v1107_v62, 0.0 }
 0x343   :  { %537 = vadd.xlane.f32.xlu0 %v536_v63 }
 0x345   :  { %v1109_v0 = vpop.eup %1108 }
 0x346   :  { %v459_v2 = vmul.f32 %v1109_v0, %v1099_v42  ;;  %v395_v3 = vpop.permute.xlu2 %394 }
 0x347   :  { %415 = vmatpush.msrb.mxu2 %v395_v3 }
 0x348   :  { %1052 = vmatmul.msk.f32.vlgmr.msra.gmra.mxu0 %vm225_vm1, %v459_v2 }
 0x349   :  { %559 = vmatpush.msra.mxu2 %v222_v1 }
 0x357   :  { %605 = vrot.lane.b32.xlu0 %v222_v1, %s1290_s12 }
 0x35f   :  { %671 = vrot.lane.b32.xlu0 %v222_v1, %s1291_s8 }
 0x367   :  { %737 = vrot.lane.b32.xlu0 %v222_v1, %s1289_s11 }
 0x36f   :  { %487 = vrot.lane.b32.xlu0 %v351_v4, %s1284_s18 }
 0x3a6   :  { %v734_v20 = vpop.xlane.xlu2 %733 }
 0x3ae   :  { %v391_v6 = vpop.xlane.xlu0 %390 }
 0x3af   :  { %1110 = vrcp.f32 %v391_v6  ;;  %v668_v14 = vpop.xlane.xlu1 %667 }
 0x3b5   :  { %v1111_v7 = vpop.eup %1110 }
 0x3b6   :  { %v538_v8 = vpop.xlane.xlu0 %537  ;;  %v393_v9 = vmul.f32 %v1111_v7, %v1103_v56  ;;  %v1294_v56 = vmov 32.0  }
 0x3b7   :  { %1112 = vrcp.f32 %v538_v8  ;;  %v876_v8 = vld [vmem:[%s1648_s5 + $0x18] sm:$0xff] }
 0x3b8   :  { %1049 = vmatmul.msk.f32.vlgmr.msrb.gmra.mxu2 %vm225_vm1, %v393_v9  ;;  %1114 = vrcp.f32 %v1485_v22  ;;  %v875_v9 = vld [vmem:[%s1648_s5 + $0x10] sm:$0xff] }
 0x3b9   :  { %1116 = vrcp.f32 %v668_v14 }
 0x3ba   :  { %1118 = vrcp.f32 %v734_v20 }
 0x3bb   :  { %1120 = vrcp.f32 %v1294_v56  ;;  %v913_v56 = vld [vmem:[%s1650_s7 + $0x8] sm:$0xff] }
 0x3bd   :  { %v1113_v12 = vpop.eup %1112 }
 0x3be   :  { %v540_v13 = vmul.f32 %v1113_v12, %v1107_v62  ;;  %v1115_v17 = vpop.eup %1114  ;;  %v874_v12 = vld [vmem:[%s1648_s5 + $0x8] sm:$0xff] }
 0x3bf   :  { %v603_v18 = vmul.f32 %v1115_v17, %v1470_v5  ;;  %v1117_v23 = vpop.eup %1116 }
 0x3c0   :  { %1055 = vmatmul.msk.f32.vlgmr.msra.gmra.mxu2 %vm225_vm1, %v540_v13  ;;  %v670_v24 = vmul.f32 %v1117_v23, %v1105_v58  ;;  %v1119_v22 = vpop.eup %1118  ;;  %v873_v13 = vld [vmem:[%s1648_s5] sm:$0xff] }
 0x3c1   :  { %v736_v26 = vmul.f32 %v1119_v22, %v1495_v51  ;;  %v1121_v57 = vpop.eup %1120  ;;  %v867_v22 = vperm.slane %v1533_v48, 1 }
 0x3c2   :  { %v823_v58 = vmul.f32 32.0, %v1121_v57  ;;  %vm827_vm4 = vweird.f32 %v1121_v57 }
 0x3c4   :  { %v824_v59 = vsub.f32 1.0, %v823_v58  ;;  %v1087_v58 = vld [vmem:[%s1649_s6] ss:$0 sm:$0xff]  ;;  %s1295_s6 = smov [#allocation11]  }
 0x3c5   :  { %v483_v16 = vpop.f32.mrf.mxu0 }
 0x3c6   :  { %495 = vrot.lane.b32.xlu0 %v483_v16, %s1292_s13  ;;  %v825_v60 = vmul.f32 %v1121_v57, %v824_v59 }
 0x3c8   :  { %v826_v61 = vadd.f32 %v1121_v57, %v825_v60 }
 0x3c9   :  { %v606_v19 = vpop.permute.xlu0 %605 }
 0x3ca   :  { %626 = vmatpush.msrb.mxu0 %v606_v19  ;;  %v1540_v62 = vsel %vm827_vm4, %v1121_v57, %v826_v61  ;;  %v912_v57 = vld [vmem:[%s1650_s7] sm:$0xff] }
 0x3cb   :  { %1058 = vmatmul.msk.f32.vlgmr.msrb.gmra.mxu0 %vm225_vm1, %v603_v18 }
 0x3d1   :  { %v672_v25 = vpop.permute.xlu0 %671 }
 0x3d2   :  { %692 = vmatpush.msrb.mxu2 %v672_v25 }
 0x3d3   :  { %1061 = vmatmul.msk.f32.vlgmr.msrb.gmra.mxu2 %vm225_vm1, %v670_v24 }
 0x3d4   :  { %899 = vmatpush.msra.mxu2 %v876_v8 }
 0x3d6   :  { %900 = vmatpush.msra.mxu2 %v875_v9 }
 0x3d8   :  { %901 = vmatpush.msra.mxu2 %v874_v12 }
 0x3d9   :  { %v738_v27 = vpop.permute.xlu0 %737 }
 0x3da   :  { %758 = vmatpush.msra.mxu0 %v738_v27  ;;  %902 = vmatpush.msra.mxu2 %v873_v13 }
 0x3db   :  { %1064 = vmatmul.msk.f32.vlgmr.msra.gmra.mxu0 %vm225_vm1, %v736_v26 }
 0x3e1   :  { %v488_v36 = vpop.permute.xlu0 %487 }
 0x3e2   :  { %v498_v37 = vsel %vm225_vm1, %v1481_v11, %v488_v36 }
 0x438   :  { %v496_v39 = vpop.permute.xlu0 %495 }
 0x43b   :  { %v417_v5 = vpop.f32.mrf.mxu2 }
 0x43c   :  { %491 = vrot.lane.b32.xlu1 %v417_v5, %s1293_s14  ;;  %v870_v5 = vperm.slane %v1533_v48, 2 }
 0x443   :  { %v561_v29 = vpop.f32.mrf.mxu2 }
 0x448   :  { %v628_v28 = vpop.f32.mrf.mxu0 }
 0x449   :  { %764 = vrot.lane.b32.xlu2 %v628_v28, %s1284_s18 }
 0x456   :  { %v694_v30 = vpop.f32.mrf.mxu2 }
 0x457   :  { %768 = vrot.lane.b32.xlu0 %v694_v30, %s1293_s14  ;;  %v927_v30 = vld [vmem:[%s1650_s7 + $0x78] sm:$0xff] }
 0x458   :  { %v760_v31 = vpop.f32.mrf.mxu0  ;;  %929 = vmatpush.msrb.mxu3 %v927_v30 }
 0x45f   :  { %772 = vrot.lane.b32.xlu0 %v760_v31, %s1292_s13  ;;  %v926_v31 = vld [vmem:[%s1650_s7 + $0x70] sm:$0xff] }
 0x460   :  { %930 = vmatpush.msrb.mxu3 %v926_v31 }
 0x462   :  { %931 = vmatpush.msrb.mxu3 %v925_v32  ;;  %v998_v32 = vperm.slane %v1533_v48, 4 }
 0x464   :  { %932 = vmatpush.msrb.mxu3 %v924_v35  ;;  %v1001_v35 = vperm.slane %v1533_v48, 5 }
 0x4a3   :  { %v765_v43 = vpop.permute.xlu2 %764 }
 0x4a4   :  { %v775_v44 = vsel %vm225_vm1, %v561_v29, %v765_v43 }
 0x4ae   :  { %v492_v38 = vpop.permute.xlu1 %491 }
 0x4af   :  { %v500_v40 = vsel %vm499_vm2, %v498_v37, %v492_v38  ;;  %v923_v37 = vld [vmem:[%s1650_s7 + $0x58] sm:$0xff]  ;;  %v922_v38 = vld [vmem:[%s1650_s7 + $0x50] sm:$0xff] }
 0x4b0   :  { %v502_v41 = vsel %vm501_vm3, %v500_v40, %v496_v39  ;;  %933 = vmatpush.msrb.mxu3 %v923_v37  ;;  %v921_v39 = vld [vmem:[%s1650_s7 + $0x48] sm:$0xff]  ;;  %v920_v40 = vld [vmem:[%s1650_s7 + $0x40] sm:$0xff] }
 0x4b1   :  { %1069 = vmatmul.msk.f32.vlgmr.msrb.gmra.mxu1 %vm127_vm0, %v502_v41 }
 0x4b2   :  { %934 = vmatpush.msrb.mxu3 %v922_v38 }
 0x4b4   :  { %935 = vmatpush.msrb.mxu3 %v921_v39 }
 0x4b6   :  { %936 = vmatpush.msrb.mxu3 %v920_v40 }
 0x4c9   :  { %v769_v42 = vpop.permute.xlu0 %768 }
 0x4ca   :  { %v776_v45 = vsel %vm499_vm2, %v775_v44, %v769_v42  ;;  %v919_v42 = vld [vmem:[%s1650_s7 + $0x38] sm:$0xff]  ;;  %v918_v44 = vld [vmem:[%s1650_s7 + $0x30] sm:$0xff] }
 0x4cb   :  { %937 = vmatpush.msrb.mxu3 %v919_v42 }
 0x4cd   :  { %938 = vmatpush.msrb.mxu3 %v918_v44 }
 0x4d1   :  { %v773_v46 = vpop.permute.xlu0 %772 }
 0x4d2   :  { %v777_v47 = vsel %vm501_vm3, %v776_v45, %v773_v46  ;;  %v917_v46 = vld [vmem:[%s1650_s7 + $0x28] sm:$0xff] }
 0x4d3   :  { %1070 = vmatmul.msk.f32.gmra.mxu1 %vm127_vm0, %v777_v47  ;;  %939 = vmatpush.msrb.mxu3 %v917_v46 }
 0x52e   :  { %v808_v11 = vpop.f32.mrf.mxu1 }
 0x52f   :  { %v809_v50 = vadd.f32 %v808_v11, %v784_v49 }
 0x531   :  { %v814_v51 = vadd.f32 %v809_v50, %v1400_v10  ;;  %v915_v50 = vld [vmem:[%s1650_s7 + $0x18] sm:$0xff] }
 0x533   :  { %v816_v52 = vsel %vm127_vm0, %v814_v51, 0.0 }
 0x534   :  { %817 = vadd.xlane.f32.xlu1 %v816_v52 }
 0x550   :  { %v811_v53 = vpop.f32.mrf.mxu1 }
 0x551   :  { %v812_v54 = vadd.f32 %v811_v53, %v784_v49  ;;  %v916_v49 = vld [vmem:[%s1650_s7 + $0x20] sm:$0xff] }
 0x552   :  { %940 = vmatpush.msrb.mxu3 %v916_v49 }
 0x553   :  { %v815_v55 = vadd.f32 %v812_v54, %v1414_v15 }
 0x554   :  { %941 = vmatpush.msrb.mxu3 %v915_v50 }
 0x555   :  { %v819_v21 = vsel %vm127_vm0, %v815_v55, 0.0 }
 0x556   :  { %820 = vadd.xlane.f32.xlu0 %v819_v21  ;;  %v914_v21 = vld [vmem:[%s1650_s7 + $0x10] sm:$0xff]  ;;  %s1010_s7 = sshll.u32 %s1295_s6, 4  ;;  %s1011_s7 = int_to_ptr.vmem [resolvable:$true] %s1010_s7 }
 0x557   :  { %942 = vmatpush.msrb.mxu3 %v914_v21 }
 0x559   :  { %943 = vmatpush.msrb.mxu3 %v913_v56 }
 0x55b   :  { %944 = vmatpush.msrb.mxu3 %v912_v57 }
 0x5a7   :  { %v818_v10 = vpop.xlane.xlu1 %817 }
 0x5a8   :  { %v829_v63 = vmul.f32 %v1540_v62, %v818_v10 }
 0x5aa   :  { %v831_v0 = vsub.f32 %v814_v51, %v829_v63 }
 0x5ac   :  { %v833_v1 = vmul.f32 %v831_v0, %v831_v0 }
 0x5ae   :  { %v835_v15 = vsel %vm127_vm0, %v833_v1, 0.0  ;;  %v928_v1 = vperm.slane %v1533_v48, 3 }
 0x5af   :  { %836 = vadd.xlane.f32.xlu2 %v835_v15 }
 0x5c9   :  { %v821_v2 = vpop.xlane.xlu0 %820 }
 0x5ca   :  { %v830_v3 = vmul.f32 %v1540_v62, %v821_v2 }
 0x5cc   :  { %v1545_v4 = vsub.f32 %v815_v55, %v830_v3 }
 0x5ce   :  { %v834_v6 = vmul.f32 %v1545_v4, %v1545_v4 }
 0x5d0   :  { %v838_v7 = vsel %vm127_vm0, %v834_v6, 0.0 }
 0x5d1   :  { %839 = vadd.xlane.f32.xlu1 %v838_v7 }
 0x622   :  { %v837_v14 = vpop.xlane.xlu2 %836 }
 0x623   :  { %v841_v16 = vmul.f32 %v837_v14, %v1540_v62 }
 0x625   :  { %v843_v17 = vadd.f32 1e-05, %v841_v16 }
 0x627   :  { %1122 = vrsqrt.f32 %v843_v17  ;;  %vm851_vm6 = vweird.f32 %v843_v17 }
 0x62d   :  { %v1123_v18 = vpop.eup %1122 }
 0x62e   :  { %v846_v19 = vmul.f32 %v1123_v18, %v843_v17  ;;  %vm852_vm5 = vweird.f32 %v1123_v18 }
 0x62f   :  { %vm853_vm7 = vmor %vm851_vm6, %vm852_vm5 }
 0x630   :  { %v847_v20 = vmul.f32 %v1123_v18, %v846_v19 }
 0x632   :  { %v848_v23 = vmul.f32 0.5, %v847_v20 }
 0x634   :  { %v849_v24 = vsub.f32 1.5, %v848_v23 }
 0x636   :  { %v850_v25 = vmul.f32 %v1123_v18, %v849_v24 }
 0x638   :  { %v854_v26 = vsel %vm853_vm7, %v1123_v18, %v850_v25 }
 0x639   :  { %v865_v27 = vmul.f32 %v854_v26, %v831_v0 }
 0x63b   :  { %v868_v28 = vmul.f32 %v867_v22, %v865_v27 }
 0x63d   :  { %v1565_v29 = vadd.f32 %v870_v5, %v868_v28 }
 0x63f   :  { %1071 = vmatmul.msk.f32.vlgmr.msra.gmra.mxu2 %vm127_vm0, %v1565_v29 }
 0x644   :  { %v840_v33 = vpop.xlane.xlu1 %839 }
 0x645   :  { %v842_v34 = vmul.f32 %v840_v33, %v1540_v62 }
 0x647   :  { %v844_v36 = vadd.f32 1e-05, %v842_v34 }
 0x649   :  { %1124 = vrsqrt.f32 %v844_v36  ;;  %vm861_vm9 = vweird.f32 %v844_v36 }
 0x64f   :  { %v1125_v41 = vpop.eup %1124 }
 0x650   :  { %v856_v43 = vmul.f32 %v1125_v41, %v844_v36  ;;  %vm862_vm8 = vweird.f32 %v1125_v41 }
 0x651   :  { %vm863_vm10 = vmor %vm861_vm9, %vm862_vm8 }
 0x652   :  { %v857_v45 = vmul.f32 %v1125_v41, %v856_v43 }
 0x654   :  { %v858_v47 = vmul.f32 0.5, %v857_v45 }
 0x656   :  { %v859_v11 = vsub.f32 1.5, %v858_v47 }
 0x658   :  { %v860_v51 = vmul.f32 %v1125_v41, %v859_v11 }
 0x65a   :  { %v864_v52 = vsel %vm863_vm10, %v1125_v41, %v860_v51 }
 0x65b   :  { %v866_v53 = vmul.f32 %v864_v52, %v1545_v4 }
 0x65d   :  { %v869_v54 = vmul.f32 %v867_v22, %v866_v53 }
 0x65f   :  { %v872_v55 = vadd.f32 %v870_v5, %v869_v54 }
 0x661   :  { %1072 = vmatmul.msk.f32.gmra.mxu2 %vm127_vm0, %v872_v55 }
 0x6c2   :  { %v904_v59 = vpop.f32.mrf.mxu2 }
 0x6c3   :  { %v905_v60 = vadd.f32 %v1087_v58, %v904_v59 }
 0x6c5   :  { %v910_v61 = vmax.f32 %v905_v60, 0.0 }
 0x6c7   :  { %945 = vmatmul.f32.vlgmr.msrb.gmra.mxu3 %v910_v61 }
 0x6e4   :  { %v907_v10 = vpop.f32.mrf.mxu2 }
 0x6e5   :  { %v908_v63 = vadd.f32 %v1087_v58, %v907_v10 }
 0x6e7   :  { %v911_v0 = vmax.f32 %v908_v63, 0.0 }
 0x6e9   :  { %948 = vmatmul.f32.gmra.mxu3 %v911_v0 }
 0x74a   :  { %v946_v15 = vpop.f32.mrf.mxu3 }
 0x74b   :  { %v947_v2 = vadd.f32 %v946_v15, %v928_v1 }
 0x74d   :  { %v952_v3 = vadd.f32 %v947_v2, %v1565_v29 }
 0x74f   :  { %v954_v4 = vsel %vm127_vm0, %v952_v3, 0.0 }
 0x750   :  { %955 = vadd.xlane.f32.xlu2 %v954_v4 }
 0x76c   :  { %v949_v6 = vpop.f32.mrf.mxu3 }
 0x76d   :  { %v950_v7 = vadd.f32 %v949_v6, %v928_v1 }
 0x76f   :  { %v953_v8 = vadd.f32 %v950_v7, %v872_v55 }
 0x771   :  { %v957_v9 = vsel %vm127_vm0, %v953_v8, 0.0 }
 0x772   :  { %958 = vadd.xlane.f32.xlu0 %v957_v9 }
 0x7c3   :  { %v956_v12 = vpop.xlane.xlu2 %955 }
 0x7c4   :  { %v960_v13 = vmul.f32 %v956_v12, %v1540_v62 }
 0x7c6   :  { %v962_v14 = vsub.f32 %v952_v3, %v960_v13 }
 0x7c8   :  { %v964_v16 = vmul.f32 %v962_v14, %v962_v14 }
 0x7ca   :  { %v966_v17 = vsel %vm127_vm0, %v964_v16, 0.0 }
 0x7cb   :  { %967 = vadd.xlane.f32.xlu1 %v966_v17 }
 0x7e5   :  { %v959_v18 = vpop.xlane.xlu0 %958 }
 0x7e6   :  { %v961_v19 = vmul.f32 %v959_v18, %v1540_v62 }
 0x7e8   :  { %v963_v20 = vsub.f32 %v953_v8, %v961_v19 }
 0x7ea   :  { %v965_v23 = vmul.f32 %v963_v20, %v963_v20 }
 0x7ec   :  { %v969_v24 = vsel %vm127_vm0, %v965_v23, 0.0 }
 0x7ed   :  { %970 = vadd.xlane.f32.xlu2 %v969_v24 }
 0x83e   :  { %v968_v25 = vpop.xlane.xlu1 %967 }
 0x83f   :  { %v972_v22 = vmul.f32 %v968_v25, %v1540_v62 }
 0x841   :  { %v974_v26 = vadd.f32 1e-05, %v972_v22 }
 0x843   :  { %1126 = vrsqrt.f32 %v974_v26  ;;  %vm982_vm12 = vweird.f32 %v974_v26 }
 0x849   :  { %v1127_v27 = vpop.eup %1126 }
 0x84a   :  { %v977_v5 = vmul.f32 %v1127_v27, %v974_v26  ;;  %vm983_vm11 = vweird.f32 %v1127_v27 }
 0x84b   :  { %vm984_vm13 = vmor %vm982_vm12, %vm983_vm11 }
 0x84c   :  { %v978_v28 = vmul.f32 %v1127_v27, %v977_v5 }
 0x84e   :  { %v979_v29 = vmul.f32 0.5, %v978_v28 }
 0x850   :  { %v980_v30 = vsub.f32 1.5, %v979_v29 }
 0x852   :  { %v981_v31 = vmul.f32 %v1127_v27, %v980_v30 }
 0x854   :  { %v985_v33 = vsel %vm984_vm13, %v1127_v27, %v981_v31 }
 0x855   :  { %v996_v34 = vmul.f32 %v985_v33, %v962_v14 }
 0x857   :  { %v999_v36 = vmul.f32 %v998_v32, %v996_v34 }
 0x859   :  { %v1002_v37 = vadd.f32 %v1001_v35, %v999_v36 }
 0x85b   :  { %1004 = vst.msk [vmem:[#allocation11] sm:$0xff] %vm127_vm0, %v1002_v37 }
 0x860   :  { %v971_v38 = vpop.xlane.xlu2 %970 }
 0x861   :  { %v973_v39 = vmul.f32 %v971_v38, %v1540_v62 }
 0x863   :  { %v975_v40 = vadd.f32 1e-05, %v973_v39 }
 0x865   :  { %1128 = vrsqrt.f32 %v975_v40  ;;  %vm992_vm15 = vweird.f32 %v975_v40 }
 0x86b   :  { %v1129_v41 = vpop.eup %1128 }
 0x86c   :  { %v987_v42 = vmul.f32 %v1129_v41, %v975_v40  ;;  %vm993_vm14 = vweird.f32 %v1129_v41 }
 0x86d   :  { %vm994_vm1 = vmor %vm992_vm15, %vm993_vm14 }
 0x86e   :  { %v988_v43 = vmul.f32 %v1129_v41, %v987_v42 }
 0x870   :  { %v989_v44 = vmul.f32 0.5, %v988_v43 }
 0x872   :  { %v990_v45 = vsub.f32 1.5, %v989_v44 }
 0x874   :  { %v991_v46 = vmul.f32 %v1129_v41, %v990_v45 }
 0x876   :  { %v995_v47 = vsel %vm994_vm1, %v1129_v41, %v991_v46 }
 0x877   :  { %v997_v48 = vmul.f32 %v995_v47, %v963_v20 }
 0x879   :  { %v1000_v62 = vmul.f32 %v998_v32, %v997_v48 }
 0x87b   :  { %v1003_v49 = vadd.f32 %v1001_v35, %v1000_v62 }
 0x87d   :  { %1005 = vst.msk [vmem:[#allocation11 + $0x8] sm:$0xff] %vm127_vm0, %v1003_v49 }
 0x87e   :  { %1018 = dma.vmem_to_hbm [thread:$0]  %s1011_s7, 256, %s1013_s15, [#allocation4], %s1283_s17, %s1283_s17, %s1284_s18  }
 0x87f   :  { %1280 = dma.done.wait [#allocation4], 256  }
 0x880   :  { %1281 = vsyncadd [#allocation4], 4294967040 }
 0x881   :  { %1023 = vsyncpa [#allocation3], 1 }
 0x882   :  { %1024 = vsyncpa [#allocation6], 1 }
 0x883   :  { %1025 = vsyncpa [#allocation9], 1 }
 0x884   :  { %1026 = vsyncpa [#allocation4], 1 }

</bundles_post_ra>
